<compile_context>
chip_gen: v7x
topology: tpu7x:2x2x1
jax: 0.10.0
libtpu: 0.0.40
codegen_flags: <defaults>
</compile_context>

<pallas_src>
import functools

import jax
import jax.numpy as jnp
from jax.experimental import pallas as pl
from jax.experimental.pallas import tpu as pltpu

LANES = 128


@functools.lru_cache(maxsize=1)
def _chip_config():
    """Return (num_tensorcores_per_chip, target_block_bytes) for the local TPU.

    v7x: 2 TCs/chip, 3.2 TB/s HBM, 64 MiB VMEM  -> 4 MiB blocks
         (2 bufs x (in + out) x 4 MiB = 16 MiB, fits the 32 MiB scoped default).
    v6e: 1 TC, 32 MiB scoped-VMEM default        -> 4 MiB blocks (16 MiB).
    v5e: 1 TC, 16 MiB scoped-VMEM default        -> 2 MiB blocks (8 MiB).
    """
    kind = ""
    try:
        kind = jax.devices()[0].device_kind.lower()
    except Exception:
        pass
    if "v7" in kind:
        return 2, 4 << 20
    if "v5e" in kind or "v5 lite" in kind or "v5lite" in kind:
        return 1, 2 << 20
    # v6e and unknown generations.
    return 1, 4 << 20


def _pick_tile_rows(rows, dtype, num_tc, target_bytes):
    """Row tile sized by a byte budget.

    The tile is a multiple of the packed-sublane count for the dtype
    (8 f32 / 16 bf16 / 32 int8-fp8) whenever it is a partial block, so the
    (8, 128) BlockSpec constraint holds; a full-dim block is always legal.
    On v7x we additionally split small inputs so each of the 2 TensorCores
    gets >= 2 blocks (keeps per-core DMA/compute double-buffering alive).
    """
    itemsize = jnp.dtype(dtype).itemsize
    sub_mult = 8 * max(1, 4 // itemsize)
    budget_rows = max(
        sub_mult, (target_bytes // (LANES * itemsize)) // sub_mult * sub_mult)
    if rows > budget_rows:
        return budget_rows
    if num_tc >= 2:
        for n_blocks in (2 * num_tc, num_tc):
            if rows >= n_blocks * sub_mult:
                tile = -(-rows // n_blocks)                 # ceil(rows / n)
                tile = -(-tile // sub_mult) * sub_mult      # round up to mult
                return min(tile, budget_rows)
    # Single TensorCore (v5e/v6e): the grid is a serial loop; splitting a
    # small input just adds ~0.35 us of fixed grid-step overhead.
    return rows


def _lower_bound_2d(x2d, bound):
    rows, _ = x2d.shape
    dtype = x2d.dtype
    itemsize = jnp.dtype(dtype).itemsize
    num_tc, target_bytes = _chip_config()
    tile_rows = _pick_tile_rows(rows, dtype, num_tc, target_bytes)
    grid = (pl.cdiv(rows, tile_rows),)  # partial final block is masked

    def kernel(x_ref, o_ref):
        # Bound baked in as a compile-time scalar constant.
        # NOTE: cast to the input dtype; for bf16/fp8 inputs the threshold is
        # rounded to that dtype (PyTorch keeps an f32 buffer and promotes) --
        # values within one ulp of the bound can differ.  Exact for f32.
        o_ref[...] = jnp.maximum(x_ref[...], jnp.asarray(bound, dtype=dtype))

    return pl.pallas_call(
        kernel,
        out_shape=jax.ShapeDtypeStruct((rows, LANES), dtype),
        grid=grid,
        in_specs=[pl.BlockSpec((tile_rows, LANES), lambda i: (i, 0))],
        out_specs=pl.BlockSpec((tile_rows, LANES), lambda i: (i, 0)),
        compiler_params=pltpu.CompilerParams(
            dimension_semantics=("parallel",),
            # Safety belt: well under physical VMEM on v5e/v6e/v7x, and lets
            # a 4 MiB-block configuration run even if generation detection
            # falls through on a v5e (16 MiB scoped default).
            vmem_limit_bytes=32 << 20,
        ),
        cost_estimate=pl.CostEstimate(
            flops=rows * LANES,
            transcendentals=0,
            bytes_accessed=2 * rows * LANES * itemsize,
        ),
    )(x2d)


def _lower_bound_impl(x, bound):
    orig_shape = x.shape
    n = x.size
    if n == 0:
        return x

    if n % LANES == 0:
        # Fast path: metadata-only reshape to a lane-dense 2-D slab.
        rows = n // LANES
        out2d = _lower_bound_2d(x.reshape(rows, LANES), bound)
        return out2d.reshape(orig_shape)

    # Ragged total element count: padding + slicing would add two full extra
    # HBM round-trips to a bandwidth-bound op, so let XLA's fused elementwise
    # maximum (already at roofline) handle this rare path.
    return jnp.maximum(x, jnp.asarray(bound, dtype=x.dtype))


@functools.partial(jax.custom_vjp, nondiff_argnums=(1,))
def lower_bound(x, bound):
    """LowerBound forward: max(x, bound), with the module's custom gradient."""
    return _lower_bound_impl(x, bound)


def _lower_bound_fwd(x, bound):
    return _lower_bound_impl(x, bound), x


def _lower_bound_bwd(bound, x, g):
    # Gradient passes through where x >= bound OR the gradient pushes x up.
    pass_through = (x >= jnp.asarray(bound, x.dtype)) | (g < 0)
    return (jnp.where(pass_through, g, jnp.zeros_like(g)),)


lower_bound.defvjp(_lower_bound_fwd, _lower_bound_bwd)


class LowerBoundPallas:
    """Mirror of the PyTorch LowerBound module."""

    def __init__(self, bound):
        # register_buffer('bound', torch.Tensor([float(bound)]))
        # TODO(synk): integer input dtypes would truncate the bound (0.11 -> 0);
        # the module is only used with float activations.
        self.bound = float(bound)

    def __call__(self, x):
        return lower_bound(x, self.bound)


if __name__ == "__main__":
    key = jax.random.PRNGKey(0)
    # NCHW input, small shapes: batch=2, channels=4, spatial=16x16
    x = jax.random.normal(key, (2, 4, 16, 16), dtype=jnp.float32)

    bound_value = 0.11
    mod = LowerBoundPallas(bound_value)

    out = jax.block_until_ready(mod(x))

    # Correctness check against plain-JAX reference (torch.max(x, bound)).
    ref = jnp.maximum(x, jnp.float32(bound_value))
    assert out.shape == x.shape and out.dtype == x.dtype
    assert bool(jnp.allclose(out, ref)), "mismatch vs reference"

    # Custom-VJP check: gradient passes through where x >= bound or g < 0.
    g = jnp.ones_like(x)
    grad = jax.block_until_ready(
        jax.grad(lambda a: jnp.sum(mod(a)))(x))
    grad_ref = jnp.where((x >= bound_value) | (g < 0), g, 0.0)
    assert bool(jnp.allclose(grad, grad_ref)), "grad mismatch vs reference"

    print("KERNEL_OK")
</pallas_src>

<mosaic_0001>
module attributes {stable_mosaic.version = 11 : i64} {
  func.func @kernel(%arg0: i32, %arg1: memref<16x128xf32, #tpu.memory_space<vmem>>, %arg2: memref<16x128xf32, #tpu.memory_space<vmem>>) attributes {dimension_semantics = [#tpu.dimension_semantics<parallel>], iteration_bounds = array<i64: 1>, scalar_prefetch = 0 : i64, scratch_operands = 0 : i64, tpu.core_type = #tpu.core_type<tc>, window_params = [{transform_indices = @transform_0, window_bounds = array<i64: 16, 128>}, {transform_indices = @transform_1, window_bounds = array<i64: 16, 128>}]} {
    %c0 = arith.constant 0 : index
    %c0_0 = arith.constant 0 : index
    %0 = vector.load %arg1[%c0, %c0_0] : memref<16x128xf32, #tpu.memory_space<vmem>>, vector<16x128xf32>
    %cst = arith.constant 1.100000e-01 : f32
    %1 = vector.broadcast %cst : f32 to vector<16x128xf32>
    %2 = arith.maximumf %0, %1 : vector<16x128xf32>
    %c0_1 = arith.constant 0 : index
    %c0_2 = arith.constant 0 : index
    %3 = vector.load %arg2[%c0_1, %c0_2] : memref<16x128xf32, #tpu.memory_space<vmem>>, vector<16x128xf32>
    tpu.vector_store %arg2[%c0_1, %c0_2], %2 {strides = array<i32>} : memref<16x128xf32, #tpu.memory_space<vmem>>, vector<16x128xf32>,
    return
  }
  func.func @transform_0(%arg0: i32) -> (i32, i32) {
    %c0_i32 = arith.constant 0 : i32
    %c0_i32_0 = arith.constant 0 : i32
    return %arg0, %c0_i32 : i32, i32
  }
  func.func @transform_1(%arg0: i32) -> (i32, i32) {
    %c0_i32 = arith.constant 0 : i32
    %c0_i32_0 = arith.constant 0 : i32
    return %arg0, %c0_i32 : i32, i32
  }
}

</mosaic_0001>

<bundles_post_ra>
// kernel: tpu_custom_call.1
= control target key start
LH: loop header
LB: loop body
LE: loop exit
PB: predicated region body
PF: predicated region fallthrough
CT: control target
= control target key end

     0   :  { %6 = vsyncpa [#allocation3], 0  ;;  %s136_s0 = inlined_call_operand.hbm [shape: f32[16,128], index: 0, kind: input, shape index: {}]   ;;  %s137_s1 = inlined_call_operand.hbm [shape: f32[16,128], index: 1, kind: output, shape index: {}]  }
   0x1   :  { %7 = vsyncpa [#allocation4], 0  ;;  %s98_s6 = smov [#allocation2]   ;;  %s50_s10 = scalar_lea.hbm %s136_s0, 256 }
   0x2   :  { %s13_s7 = sshll.u32 %s98_s6, 4  ;;  %p51_p0 = scmp.ne.s32.totalorder %s136_s0, %s50_s10  ;;  %s14_s7 = int_to_ptr.vmem [resolvable:$true] %s13_s7 }
   0x3   :  { %p54_p1 = scmp.lt.u32.totalorder %s50_s10, %s136_s0 }
   0x5   :  { %p56_p2 = pnand %p54_p1, %p51_p0 }
   0x7   :  { %59 = shalt.err (!%p56_p2)
}
   0x8   :  { %s60_s15 = scalar_lea.vmem %s14_s7, 256  ;;  %p65_p4 = scmp.lt.s32.totalorder %s14_s7, %s14_s7 }
   0x9   :  { %p61_p3 = scmp.ne.s32.totalorder %s14_s7, %s60_s15  ;;  %p66_p5 = scmp.lt.s32.totalorder %s60_s15, %s60_s15 }
   0xb   :  { %p67_p6 = por %p66_p5, %p65_p4 }
   0xd   :  { %p68_p7 = pnand %p67_p6, %p61_p3 }
   0xf   :  { %71 = shalt.err (!%p68_p7)
}
  0x10   :  { %s99_s16 = smov 128   ;;  %s100_s17 = smov 8  }
  0x11   :  { %19 = dma.hbm_to_vmem [thread:$0]  %s136_s0, 256, %s14_s7, [#allocation3], %s99_s16, %s99_s16, %s100_s17  }
  0x12   :  { %94 = dma.done.wait [#allocation3], 256  }
  0x13   :  { %95 = vsyncadd [#allocation3], 4294967040  ;;  %s101_s20 = smov [#allocation5]   ;;  %v23_v0 = vld [vmem:[#allocation2] sm:$0xff]  ;;  %v24_v1 = vld [vmem:[#allocation2 + $0x8] sm:$0xff] }
  0x14   :  { %s34_s21 = sshll.u32 %s101_s20, 4  ;;  %v25_v2 = vmax.f32 %v23_v0, 0.11  ;;  %v26_v3 = vmax.f32 %v24_v1, 0.11  ;;  %s35_s21 = int_to_ptr.vmem [resolvable:$true] %s34_s21 }
  0x15   :  { %s72_s22 = scalar_lea.vmem %s35_s21, 256  ;;  %p77_p9 = scmp.lt.s32.totalorder %s35_s21, %s35_s21 }
  0x16   :  { %27 = vst [vmem:[#allocation5] sm:$0xff] %v25_v2  ;;  %28 = vst [vmem:[#allocation5 + $0x8] sm:$0xff] %v26_v3  ;;  %p73_p8 = scmp.ne.s32.totalorder %s35_s21, %s72_s22  ;;  %p78_p10 = scmp.lt.s32.totalorder %s72_s22, %s72_s22 }
  0x18   :  { %p79_p11 = por %p78_p10, %p77_p9 }
  0x1a   :  { %p80_p12 = pnand %p79_p11, %p73_p8 }
  0x1c   :  { %83 = shalt.err (!%p80_p12)
}
  0x1d   :  { %s84_s24 = scalar_lea.hbm %s137_s1, 256 }
  0x1e   :  { %p85_p13 = scmp.ne.s32.totalorder %s137_s1, %s84_s24  ;;  %p88_p0 = scmp.lt.u32.totalorder %s84_s24, %s137_s1 }
  0x20   :  { %p90_p1 = pnand %p88_p0, %p85_p13 }
  0x22   :  { %93 = shalt.err (!%p90_p1)
}
  0x23   :  { %40 = dma.vmem_to_hbm [thread:$0]  %s35_s21, 256, %s137_s1, [#allocation4], %s99_s16, %s99_s16, %s100_s17  }
  0x24   :  { %96 = dma.done.wait [#allocation4], 256  }
  0x25   :  { %97 = vsyncadd [#allocation4], 4294967040 }
  0x26   :  { %44 = vsyncpa [#allocation3], 1 }
  0x27   :  { %45 = vsyncpa [#allocation4], 1 }

</bundles_post_ra>
